<compile_context>
chip_gen: v7x
topology: tpu7x:2x2x1
jax: 0.10.0
libtpu: 0.0.40
codegen_flags: <defaults>
</compile_context>

<pallas_src>
import math

import jax
import jax.numpy as jnp
from jax.experimental import pallas as pl
from jax.experimental.pallas import tpu as pltpu


def _round_up(x, m):
    return ((x + m - 1) // m) * m


def _tpu_vmem_capacity_bytes():
    """Per-core VMEM capacity; conservative 64 MiB (v7x) if the query fails."""
    try:
        return int(pltpu.get_tpu_info().vmem_capacity_bytes)
    except Exception:
        return 64 << 20


def _resid_linear_kernel(x_ref, w_ref, b_ref, o_ref):
    # x_ref: (tm, n_pad) f32, w_ref: (n_pad, n_pad) bf16, b_ref: (1, n_pad) f32.
    x = x_ref[...]
    # Cast to the MXU dtype *inside* the kernel; accumulate in f32.
    acc = jnp.dot(x.astype(w_ref.dtype), w_ref[...],
                  preferred_element_type=jnp.float32)
    # Bias + full-precision residual + tanh in f32 (VPU + EUP).
    acc = acc + b_ref[...] + x.astype(jnp.float32)
    o_ref[...] = jnp.tanh(acc).astype(o_ref.dtype)


def prepare_resid_linear_params(w, b, *, compute_dtype=jnp.bfloat16):
    """Pad+cast the weight/bias once (hoisted out of the per-call path).

    w: (n_in, n_out) with n_in == n_out (transposed vs. torch nn.Linear's
    (n_out, n_in) layout); b: (n_out,). Returns (w_c, b_c) with w_c of shape
    (n_pad, n_pad) in compute_dtype and b_c of shape (1, n_pad) in f32,
    where n_pad is the next multiple of 128 (lane-dense).
    """
    n_in, n_out = w.shape
    assert n_in == n_out, "ResidLinear requires n_in == n_out"
    n_pad = _round_up(n_out, 128)
    w_c = w.astype(compute_dtype)
    b_c = b.astype(jnp.float32)
    if n_pad != n_out:
        w_c = jnp.pad(w_c, ((0, n_pad - n_in), (0, n_pad - n_out)))
        b_c = jnp.pad(b_c, (0, n_pad - n_out))
    return w_c, b_c.reshape(1, n_pad)


def resid_linear(x, w, b, *, tm=None, compute_dtype=jnp.bfloat16, out_dtype=None):
    """y = tanh(x @ w + b + x).

    x: (M, n).  (w, b) may be either the raw ((n, n), (n,)) parameters or the
    output of prepare_resid_linear_params (pre-padded/cast; avoids per-call
    O(n^2) prep).  Arbitrary M / n are handled by zero-padding to TPU tiles.
    """
    M, n = x.shape
    if out_dtype is None:
        out_dtype = x.dtype

    prepared = (
        w.ndim == 2 and w.shape[0] == w.shape[1] and w.shape[0] % 128 == 0
        and w.shape[0] >= n and w.dtype == jnp.dtype(compute_dtype)
        and b.ndim == 2 and b.shape == (1, w.shape[0]) and b.dtype == jnp.float32
    )
    if prepared:
        w_c, b_c = w, b
    else:
        assert w.shape == (n, n) and b.shape == (n,), (
            "expected w of shape (n_in, n_out) with n_in == n_out == x features")
        w_c, b_c = prepare_resid_linear_params(w, b, compute_dtype=compute_dtype)
    n_pad = w_c.shape[0]

    # --- batch tiling: minimize padding, keep the pipeline / both TCs fed ---
    vmem_capacity = _tpu_vmem_capacity_bytes()
    big_vmem = vmem_capacity >= (96 << 20)      # v5e/v6e (128 MiB) vs v7x (64 MiB)
    if tm is None:
        tm_cap = 1024 if (big_vmem and n_pad <= 512) else 512
        grid_m = max(1, pl.cdiv(M, tm_cap))
        if (not big_vmem) and M >= 1024:
            # v7x: the 'parallel' grid axis is sharded across 2 TensorCores;
            # keep it even and >= 4 steps so both cores stay double-buffered.
            grid_m = max(grid_m, 4)
            grid_m += grid_m % 2
        tm = _round_up(pl.cdiv(M, grid_m), 8)
    tm = _round_up(max(int(tm), 8), 8)
    grid_m = pl.cdiv(M, tm)
    m_pad = grid_m * tm

    # x stays in its original dtype; pad only when actually needed.
    x_c = x
    if m_pad != M or n_pad != n:
        x_c = jnp.pad(x, ((0, m_pad - M), (0, n_pad - n)))

    x_item = jnp.dtype(x.dtype).itemsize
    w_item = jnp.dtype(w_c.dtype).itemsize
    o_item = jnp.dtype(out_dtype).itemsize

    def vmem_bytes(weight_buffers):
        return (2 * tm * n_pad * x_item                      # x tiles (double-buffered)
                + 2 * tm * n_pad * o_item                    # out tiles (double-buffered)
                + weight_buffers * n_pad * n_pad * w_item    # resident weight
                + weight_buffers * 8 * n_pad * 4)            # bias (sublane-padded)

    cost = pl.CostEstimate(
        flops=2 * m_pad * n_pad * n_pad,
        transcendentals=m_pad * n_pad,                        # tanh
        bytes_accessed=(m_pad * n_pad * x_item                # x
                        + n_pad * n_pad * w_item              # w
                        + n_pad * 4                           # b
                        + m_pad * n_pad * o_item),            # out
    )

    def make_call(weight_buffers):
        resident = ({"pipeline_mode": pl.Buffered(1)} if weight_buffers == 1 else {})
        limit = min(max(vmem_bytes(weight_buffers) + (8 << 20), 32 << 20),
                    int(vmem_capacity * 0.75))
        limit = max(limit, vmem_bytes(weight_buffers) + (2 << 20))
        return pl.pallas_call(
            _resid_linear_kernel,
            out_shape=jax.ShapeDtypeStruct((m_pad, n_pad), out_dtype),
            grid_spec=pltpu.PrefetchScalarGridSpec(
                num_scalar_prefetch=0,
                grid=(grid_m,),
                in_specs=[
                    pl.BlockSpec((tm, n_pad), lambda i: (i, 0)),
                    # Constant index maps: weight/bias stay resident in VMEM;
                    # single-buffered they cost only one copy.
                    pl.BlockSpec((n_pad, n_pad), lambda i: (0, 0), **resident),
                    pl.BlockSpec((1, n_pad), lambda i: (0, 0), **resident),
                ],
                out_specs=pl.BlockSpec((tm, n_pad), lambda i: (i, 0)),
            ),
            compiler_params=pltpu.CompilerParams(
                dimension_semantics=("parallel",),
                vmem_limit_bytes=int(limit),
            ),
            cost_estimate=cost,
        )

    try:
        out = make_call(1)(x_c, w_c, b_c)
    except Exception:
        # Fallback if single-buffered resident specs are rejected by this
        # jax / libtpu version.
        out = make_call(2)(x_c, w_c, b_c)

    if m_pad != M or n_pad != n:
        out = out[:M, :n]
    return out


if __name__ == "__main__":
    key = jax.random.PRNGKey(0)

    def make_params(n, kseed):
        kw, kb = jax.random.split(kseed)
        bound = 1.0 / math.sqrt(n)
        # torch nn.Linear weight layout is (n_out, n_in); kernel takes (n_in, n_out).
        w_pt = jax.random.uniform(kw, (n, n), jnp.float32, -bound, bound)
        w = w_pt.T
        b = jax.random.uniform(kb, (n,), jnp.float32, -bound, bound)
        return w, b

    def check(y, x, w, b):
        assert y.shape == x.shape
        # Exact-math reference for the kernel: bf16 matmul operands, f32
        # accumulation, f32 bias + full-precision f32 residual.
        xb = x.astype(jnp.bfloat16).astype(jnp.float32)
        wb = w.astype(jnp.bfloat16).astype(jnp.float32)
        y_ref = jnp.tanh(jnp.dot(xb, wb, preferred_element_type=jnp.float32) + b + x)
        assert jnp.allclose(y, y_ref, atol=2e-4, rtol=2e-4)
        # Loose check against the full-f32 PyTorch-equivalent forward.
        y_f32 = jnp.tanh(x @ w + b + x)
        assert jnp.allclose(y, y_f32, atol=5e-2, rtol=5e-2)

    k1, k2, k3 = jax.random.split(key, 3)

    # Small shape consistent with ResidLinear(32, 32), batch of 8 — exercises
    # the pre-prepared-params (hoisted pad/cast) path.
    w1, b1 = make_params(32, k1)
    x1 = jax.random.normal(k3, (8, 32), jnp.float32)
    w1p, b1p = prepare_resid_linear_params(w1, b1)
    y1 = resid_linear(x1, w1p, b1p)
    jax.block_until_ready(y1)
    check(y1, x1, w1, b1)

    # Non-divisible batch / feature sizes via the raw-parameter path.
    w2, b2 = make_params(48, k2)
    x2 = jax.random.normal(k1, (300, 48), jnp.float32)
    y2 = resid_linear(x2, w2, b2)
    jax.block_until_ready(y2)
    check(y2, x2, w2, b2)

    # Forced multi-step pipelined 'parallel' grid (tm=128 -> 3 grid steps).
    y2b = resid_linear(x2, w2, b2, tm=128)
    jax.block_until_ready(y2b)
    check(y2b, x2, w2, b2)

    print("KERNEL_OK")
</pallas_src>

<mosaic_0001>
module attributes {stable_mosaic.version = 11 : i64} {
  func.func @_resid_linear_kernel(%arg0: i32, %arg1: memref<8x128xf32, #tpu.memory_space<vmem>>, %arg2: memref<128x128xbf16, #tpu.memory_space<vmem>>, %arg3: memref<1x128xf32, #tpu.memory_space<vmem>>, %arg4: memref<8x128xf32, #tpu.memory_space<vmem>>) attributes {dimension_semantics = [#tpu.dimension_semantics<parallel>], iteration_bounds = array<i64: 1>, scalar_prefetch = 0 : i64, scratch_operands = 0 : i64, tpu.core_type = #tpu.core_type<tc>, window_params = [{transform_indices = @transform_0, window_bounds = array<i64: 8, 128>}, {pipeline_mode = #tpu.pipeline_mode<synchronous>, transform_indices = @transform_1, window_bounds = array<i64: 128, 128>}, {pipeline_mode = #tpu.pipeline_mode<synchronous>, transform_indices = @transform_2, window_bounds = array<i64: 1, 128>}, {transform_indices = @transform_3, window_bounds = array<i64: 8, 128>}]} {
    %c0 = arith.constant 0 : index
    %c0_0 = arith.constant 0 : index
    %0 = vector.load %arg1[%c0, %c0_0] : memref<8x128xf32, #tpu.memory_space<vmem>>, vector<8x128xf32>
    %1 = arith.truncf %0 : vector<8x128xf32> to vector<8x128xbf16>
    %c0_1 = arith.constant 0 : index
    %c0_2 = arith.constant 0 : index
    %2 = vector.load %arg2[%c0_1, %c0_2] : memref<128x128xbf16, #tpu.memory_space<vmem>>, vector<128x128xbf16>
    %cst = arith.constant dense<0.000000e+00> : vector<8x128xf32>
    %3 = tpu.matmul %1, %2, %cst {dimension_numbers = #tpu.dot_dimension_numbers<[1], [0], [0], [1], [0, 0, 1, 1], [], []>} : vector<8x128xbf16>, vector<128x128xbf16>, vector<8x128xf32> -> vector<8x128xf32>
    %c0_3 = arith.constant 0 : index
    %c0_4 = arith.constant 0 : index
    %4 = vector.load %arg3[%c0_3, %c0_4] : memref<1x128xf32, #tpu.memory_space<vmem>>, vector<1x128xf32>
    %5 = vector.broadcast %4 : vector<1x128xf32> to vector<8x128xf32>
    %6 = arith.addf %3, %5 : vector<8x128xf32>
    %7 = arith.addf %6, %0 : vector<8x128xf32>
    %8 = math.tanh %7 : vector<8x128xf32>
    %c0_5 = arith.constant 0 : index
    %c0_6 = arith.constant 0 : index
    %9 = vector.load %arg4[%c0_5, %c0_6] : memref<8x128xf32, #tpu.memory_space<vmem>>, vector<8x128xf32>
    tpu.vector_store %arg4[%c0_5, %c0_6], %8 {strides = array<i32>} : memref<8x128xf32, #tpu.memory_space<vmem>>, vector<8x128xf32>,
    return
  }
  func.func @transform_0(%arg0: i32) -> (i32, i32) {
    %c0_i32 = arith.constant 0 : i32
    %c0_i32_0 = arith.constant 0 : i32
    return %arg0, %c0_i32 : i32, i32
  }
  func.func @transform_1(%arg0: i32) -> (i32, i32) {
    %c0_i32 = arith.constant 0 : i32
    %c0_i32_0 = arith.constant 0 : i32
    %c0_i32_1 = arith.constant 0 : i32
    return %c0_i32, %c0_i32_0 : i32, i32
  }
  func.func @transform_2(%arg0: i32) -> (i32, i32) {
    %c0_i32 = arith.constant 0 : i32
    %c0_i32_0 = arith.constant 0 : i32
    %c0_i32_1 = arith.constant 0 : i32
    return %c0_i32, %c0_i32_0 : i32, i32
  }
  func.func @transform_3(%arg0: i32) -> (i32, i32) {
    %c0_i32 = arith.constant 0 : i32
    %c0_i32_0 = arith.constant 0 : i32
    return %arg0, %c0_i32 : i32, i32
  }
}

module attributes {stable_mosaic.version = 11 : i64} {
  func.func @_resid_linear_kernel(%arg0: i32, %arg1: memref<8x128xf32, #tpu.memory_space<vmem>>, %arg2: memref<128x128xbf16, #tpu.memory_space<vmem>>, %arg3: memref<1x128xf32, #tpu.memory_space<vmem>>, %arg4: memref<8x128xf32, #tpu.memory_space<vmem>>) attributes {dimension_semantics = [#tpu.dimension_semantics<parallel>], iteration_bounds = array<i64: 1>, scalar_prefetch = 0 : i64, scratch_operands = 0 : i64, tpu.core_type = #tpu.core_type<tc>, window_params = [{transform_indices = @transform_0, window_bounds = array<i64: 8, 128>}, {pipeline_mode = #tpu.pipeline_mode<synchronous>, transform_indices = @transform_1, window_bounds = array<i64: 128, 128>}, {pipeline_mode = #tpu.pipeline_mode<synchronous>, transform_indices = @transform_2, window_bounds = array<i64: 1, 128>}, {transform_indices = @transform_3, window_bounds = array<i64: 8, 128>}]} {
    %c0 = arith.constant 0 : index
    %c0_0 = arith.constant 0 : index
    %0 = vector.load %arg1[%c0, %c0_0] : memref<8x128xf32, #tpu.memory_space<vmem>>, vector<8x128xf32>
    %1 = arith.truncf %0 : vector<8x128xf32> to vector<8x128xbf16>
    %c0_1 = arith.constant 0 : index
    %c0_2 = arith.constant 0 : index
    %2 = vector.load %arg2[%c0_1, %c0_2] : memref<128x128xbf16, #tpu.memory_space<vmem>>, vector<128x128xbf16>
    %cst = arith.constant dense<0.000000e+00> : vector<8x128xf32>
    %3 = tpu.matmul %1, %2, %cst {dimension_numbers = #tpu.dot_dimension_numbers<[1], [0], [0], [1], [0, 0, 1, 1], [], []>} : vector<8x128xbf16>, vector<128x128xbf16>, vector<8x128xf32> -> vector<8x128xf32>
    %c0_3 = arith.constant 0 : index
    %c0_4 = arith.constant 0 : index
    %4 = vector.load %arg3[%c0_3, %c0_4] : memref<1x128xf32, #tpu.memory_space<vmem>>, vector<1x128xf32>
    %5 = vector.broadcast %4 : vector<1x128xf32> to vector<8x128xf32>
    %6 = arith.addf %3, %5 : vector<8x128xf32>
    %7 = arith.addf %6, %0 : vector<8x128xf32>
    %8 = math.tanh %7 : vector<8x128xf32>
    %c0_5 = arith.constant 0 : index
    %c0_6 = arith.constant 0 : index
    %9 = vector.load %arg4[%c0_5, %c0_6] : memref<8x128xf32, #tpu.memory_space<vmem>>, vector<8x128xf32>
    tpu.vector_store %arg4[%c0_5, %c0_6], %8 {strides = array<i32>} : memref<8x128xf32, #tpu.memory_space<vmem>>, vector<8x128xf32>,
    return
  }
  func.func @transform_0(%arg0: i32) -> (i32, i32) {
    %c0_i32 = arith.constant 0 : i32
    %c0_i32_0 = arith.constant 0 : i32
    return %arg0, %c0_i32 : i32, i32
  }
  func.func @transform_1(%arg0: i32) -> (i32, i32) {
    %c0_i32 = arith.constant 0 : i32
    %c0_i32_0 = arith.constant 0 : i32
    %c0_i32_1 = arith.constant 0 : i32
    return %c0_i32, %c0_i32_0 : i32, i32
  }
  func.func @transform_2(%arg0: i32) -> (i32, i32) {
    %c0_i32 = arith.constant 0 : i32
    %c0_i32_0 = arith.constant 0 : i32
    %c0_i32_1 = arith.constant 0 : i32
    return %c0_i32, %c0_i32_0 : i32, i32
  }
  func.func @transform_3(%arg0: i32) -> (i32, i32) {
    %c0_i32 = arith.constant 0 : i32
    %c0_i32_0 = arith.constant 0 : i32
    return %arg0, %c0_i32 : i32, i32
  }
}

</mosaic_0001>

<bundles_post_ra>
// kernel: tpu_custom_call.1
= control target key start
LH: loop header
LB: loop body
LE: loop exit
PB: predicated region body
PF: predicated region fallthrough
CT: control target
= control target key end

     0   :  { %8 = vsyncpa [#allocation3], 0  ;;  %s374_s0 = inlined_call_operand.hbm [shape: f32[8,128], index: 0, kind: input, shape index: {}]   ;;  %s375_s1 = inlined_call_operand.hbm [shape: bf16[128,128], index: 1, kind: input, shape index: {}]   ;;  %s376_s2 = inlined_call_operand.vmem [shape: f32[1,128], index: 2, kind: input, shape index: {}]   ;;  %s377_s3 = inlined_call_operand.hbm [shape: f32[8,128], index: 3, kind: output, shape index: {}]  }
   0x1   :  { %9 = vsyncpa [#allocation6], 0 }
   0x2   :  { %10 = vsyncpa [#allocation4], 0  ;;  %s301_s12 = smov [#allocation2]   ;;  %s302_s14 = smov [#allocation5]  }
   0x3   :  { %s17_s13 = sshll.u32 %s301_s12, 4  ;;  %s26_s15 = sshll.u32 %s302_s14, 4  ;;  %s18_s13 = int_to_ptr.vmem [resolvable:$true] %s17_s13  ;;  %s328_s15 = int_to_ptr.vmem [resolvable:$true] %s26_s15 }
   0x4   :  { %s229_s18 = scalar_lea.hbm %s374_s0, 128 }
   0x5   :  { %p230_p0 = scmp.ne.s32.totalorder %s374_s0, %s229_s18  ;;  %p233_p1 = scmp.lt.u32.totalorder %s229_s18, %s374_s0 }
   0x7   :  { %p235_p2 = pnand %p233_p1, %p230_p0 }
   0x9   :  { %238 = shalt.err (!%p235_p2)
}
   0xa   :  { %s239_s23 = scalar_lea.vmem %s18_s13, 128  ;;  %p244_p4 = scmp.lt.s32.totalorder %s18_s13, %s18_s13 }
   0xb   :  { %p240_p3 = scmp.ne.s32.totalorder %s18_s13, %s239_s23  ;;  %p245_p5 = scmp.lt.s32.totalorder %s239_s23, %s239_s23 }
   0xd   :  { %p246_p6 = por %p245_p5, %p244_p4 }
   0xf   :  { %p247_p7 = pnand %p246_p6, %p240_p3 }
  0x11   :  { %250 = shalt.err (!%p247_p7)
}
  0x12   :  { %20 = dma.hbm_to_vmem [thread:$0]  %s374_s0, 128, %s18_s13, [#allocation3]  }
  0x13   :  { %s251_s28 = scalar_lea.hbm %s375_s1, 1024 }
  0x14   :  { %p252_p8 = scmp.ne.s32.totalorder %s375_s1, %s251_s28  ;;  %p255_p9 = scmp.lt.u32.totalorder %s251_s28, %s375_s1 }
  0x16   :  { %p257_p10 = pnand %p255_p9, %p252_p8 }
  0x18   :  { %260 = shalt.err (!%p257_p10)
}
  0x19   :  { %s261_s6 = scalar_lea.vmem %s328_s15, 1024  ;;  %p266_p12 = scmp.lt.s32.totalorder %s328_s15, %s328_s15 }
  0x1a   :  { %p262_p11 = scmp.ne.s32.totalorder %s328_s15, %s261_s6  ;;  %p267_p13 = scmp.lt.s32.totalorder %s261_s6, %s261_s6 }
  0x1c   :  { %p268_p0 = por %p267_p13, %p266_p12 }
  0x1e   :  { %p269_p1 = pnand %p268_p0, %p262_p11 }
  0x20   :  { %272 = shalt.err (!%p269_p1)
}
  0x21   :  { %s303_s0 = smov 64   ;;  %s304_s7 = smov 4  }
  0x22   :  { %32 = dma.hbm_to_vmem [thread:$0]  %s375_s1, 1024, %s328_s15, [#allocation6], %s303_s0, %s303_s0, %s304_s7  }
  0x23   :  { %295 = dma.done.wait [#allocation3], 128  }
  0x24   :  { %296 = vsyncadd [#allocation3], 4294967168 }
  0x25   :  { %297 = dma.done.wait [#allocation6], 1024  }
  0x26   :  { %298 = vsyncadd [#allocation6], 4294966272  ;;  %v305_v0 = vmov 0.0   ;;  %vm306_vm0 = vmmov 0   ;;  %v219_v1 = vld [vmem:[#allocation5] sm:$0xff]   ;;  %v220_v2 = vld [vmem:[#allocation5 + $0x8] sm:$0xff]  }
  0x27   :  { %192 = vmatprep.subr.bf16.mxu0 %v305_v0  ;;  %208 = vmatprep.mubr.msk.bf16.mxu0 %vm306_vm0, %v305_v0  ;;  %v221_v3 = vld [vmem:[#allocation5 + $0x10] sm:$0xff]   ;;  %v222_v4 = vld [vmem:[#allocation5 + $0x18] sm:$0xff]   ;;  %v223_v5 = vld [vmem:[#allocation5 + $0x20] sm:$0xff]   ;;  %s307_s11 = smov [#allocation7]  }
  0x28   :  { %193 = vmatpush3.bf16.msra.mxu0 %v219_v1  ;;  %v224_v6 = vld [vmem:[#allocation5 + $0x28] sm:$0xff]   ;;  %v225_v7 = vld [vmem:[#allocation5 + $0x30] sm:$0xff]   ;;  %v226_v8 = vld [vmem:[#allocation5 + $0x38] sm:$0xff]   ;;  %s164_s12 = sshll.u32 %s307_s11, 4  ;;  %s165_s12 = int_to_ptr.vmem [resolvable:$true] %s164_s12 }
  0x29   :  { %194 = vmatprep.subr.bf16.mxu0 %v305_v0  ;;  %v42_v9 = vld [vmem:[#allocation2] sm:$0xff]  ;;  %s273_s13 = scalar_lea.vmem %s165_s12, 128  ;;  %p278_p3 = scmp.lt.s32.totalorder %s165_s12, %s165_s12 }
  0x2a   :  { %v43_v10 = vpack.c.bf16 %v42_v9, %v42_v9  ;;  %v174_v11 = vld [vmem:[%s376_s2] ss:$0 sm:$0xff]  ;;  %p274_p2 = scmp.ne.s32.totalorder %s165_s12, %s273_s13  ;;  %p279_p4 = scmp.lt.s32.totalorder %s273_s13, %s273_s13 }
  0x2c   :  { %195 = vmatpush3.bf16.msra.mxu0 %v220_v2  ;;  %p280_p5 = por %p279_p4, %p278_p3 }
  0x2d   :  { %196 = vmatprep.subr.bf16.mxu0 %v305_v0 }
  0x2e   :  { %p281_p6 = pnand %p280_p5, %p274_p2 }
  0x30   :  { %197 = vmatpush3.bf16.msra.mxu0 %v221_v3 }
  0x31   :  { %198 = vmatprep.subr.bf16.mxu0 %v305_v0 }
  0x34   :  { %199 = vmatpush3.bf16.msra.mxu0 %v222_v4 }
  0x35   :  { %200 = vmatprep.subr.bf16.mxu0 %v305_v0 }
  0x38   :  { %201 = vmatpush3.bf16.msra.mxu0 %v223_v5 }
  0x39   :  { %202 = vmatprep.subr.bf16.mxu0 %v305_v0 }
  0x3c   :  { %203 = vmatpush3.bf16.msra.mxu0 %v224_v6 }
  0x3d   :  { %204 = vmatprep.subr.bf16.mxu0 %v305_v0 }
  0x40   :  { %205 = vmatpush3.bf16.msra.mxu0 %v225_v7 }
  0x41   :  { %206 = vmatprep.subr.bf16.mxu0 %v305_v0 }
  0x44   :  { %207 = vmatpush3.bf16.msra.mxu0 %v226_v8 }
  0x47   :  { %209 = vmatmul.mubr.bf16.vlgmr.msra.gmra.mrb[0].mxu0 %v43_v10 }
 0x11a   :  { %v149_v12 = vpop.f32.mrb[0].mxu0 }
 0x11b   :  { %v150_v13 = vadd.f32 %v174_v11, %v149_v12  ;;  %v210_v14 = vpop.f32.mrb[1].mxu0 }
 0x11c   :  { %v152_v15 = vpop.f32.mrb[2].mxu0 }
 0x11d   :  { %v155_v16 = vadd.f32 %v150_v13, %v42_v9  ;;  %v211_v17 = vpop.f32.mrb[3].mxu0 }
 0x11f   :  { %227 = vtanh.f32 %v155_v16 }
 0x129   :  { %v228_v18 = vpop.eup %227 }
 0x12a   :  { %157 = vst [vmem:[#allocation7] sm:$0xff] %v228_v18 }
 0x12b   :  { %284 = shalt.err (!%p281_p6)
}
 0x12c   :  { %s285_s15 = scalar_lea.hbm %s377_s3, 128 }
 0x12d   :  { %p286_p7 = scmp.ne.s32.totalorder %s377_s3, %s285_s15  ;;  %p289_p8 = scmp.lt.u32.totalorder %s285_s15, %s377_s3 }
 0x12f   :  { %p291_p9 = pnand %p289_p8, %p286_p7 }
 0x131   :  { %294 = shalt.err (!%p291_p9)
}
 0x132   :  { %167 = dma.vmem_to_hbm [thread:$0]  %s165_s12, 128, %s377_s3, [#allocation4]  }
 0x133   :  { %299 = dma.done.wait [#allocation4], 128  }
 0x134   :  { %300 = vsyncadd [#allocation4], 4294967168 }
 0x135   :  { %171 = vsyncpa [#allocation3], 1 }
 0x136   :  { %172 = vsyncpa [#allocation6], 1 }
 0x137   :  { %173 = vsyncpa [#allocation4], 1 }

// kernel: tpu_custom_call.1
= control target key start
LH: loop header
LB: loop body
LE: loop exit
PB: predicated region body
PF: predicated region fallthrough
CT: control target
= control target key end

     0   :  { %8 = vsyncpa [#allocation3], 0  ;;  %s374_s0 = inlined_call_operand.hbm [shape: f32[8,128], index: 0, kind: input, shape index: {}]   ;;  %s375_s1 = inlined_call_operand.hbm [shape: bf16[128,128], index: 1, kind: input, shape index: {}]   ;;  %s376_s2 = inlined_call_operand.vmem [shape: f32[1,128], index: 2, kind: input, shape index: {}]   ;;  %s377_s3 = inlined_call_operand.hbm [shape: f32[8,128], index: 3, kind: output, shape index: {}]  }
   0x1   :  { %9 = vsyncpa [#allocation6], 0 }
   0x2   :  { %10 = vsyncpa [#allocation4], 0  ;;  %s301_s12 = smov [#allocation2]   ;;  %s302_s14 = smov [#allocation5]  }
   0x3   :  { %s17_s13 = sshll.u32 %s301_s12, 4  ;;  %s26_s15 = sshll.u32 %s302_s14, 4  ;;  %s18_s13 = int_to_ptr.vmem [resolvable:$true] %s17_s13  ;;  %s328_s15 = int_to_ptr.vmem [resolvable:$true] %s26_s15 }
   0x4   :  { %s229_s18 = scalar_lea.hbm %s374_s0, 128 }
   0x5   :  { %p230_p0 = scmp.ne.s32.totalorder %s374_s0, %s229_s18  ;;  %p233_p1 = scmp.lt.u32.totalorder %s229_s18, %s374_s0 }
   0x7   :  { %p235_p2 = pnand %p233_p1, %p230_p0 }
   0x9   :  { %238 = shalt.err (!%p235_p2)
}
   0xa   :  { %s239_s23 = scalar_lea.vmem %s18_s13, 128  ;;  %p244_p4 = scmp.lt.s32.totalorder %s18_s13, %s18_s13 }
   0xb   :  { %p240_p3 = scmp.ne.s32.totalorder %s18_s13, %s239_s23  ;;  %p245_p5 = scmp.lt.s32.totalorder %s239_s23, %s239_s23 }
   0xd   :  { %p246_p6 = por %p245_p5, %p244_p4 }
   0xf   :  { %p247_p7 = pnand %p246_p6, %p240_p3 }
  0x11   :  { %250 = shalt.err (!%p247_p7)
}
  0x12   :  { %20 = dma.hbm_to_vmem [thread:$0]  %s374_s0, 128, %s18_s13, [#allocation3]  }
  0x13   :  { %s251_s28 = scalar_lea.hbm %s375_s1, 1024 }
  0x14   :  { %p252_p8 = scmp.ne.s32.totalorder %s375_s1, %s251_s28  ;;  %p255_p9 = scmp.lt.u32.totalorder %s251_s28, %s375_s1 }
  0x16   :  { %p257_p10 = pnand %p255_p9, %p252_p8 }
  0x18   :  { %260 = shalt.err (!%p257_p10)
}
  0x19   :  { %s261_s6 = scalar_lea.vmem %s328_s15, 1024  ;;  %p266_p12 = scmp.lt.s32.totalorder %s328_s15, %s328_s15 }
  0x1a   :  { %p262_p11 = scmp.ne.s32.totalorder %s328_s15, %s261_s6  ;;  %p267_p13 = scmp.lt.s32.totalorder %s261_s6, %s261_s6 }
  0x1c   :  { %p268_p0 = por %p267_p13, %p266_p12 }
  0x1e   :  { %p269_p1 = pnand %p268_p0, %p262_p11 }
  0x20   :  { %272 = shalt.err (!%p269_p1)
}
  0x21   :  { %s303_s0 = smov 64   ;;  %s304_s7 = smov 4  }
  0x22   :  { %32 = dma.hbm_to_vmem [thread:$0]  %s375_s1, 1024, %s328_s15, [#allocation6], %s303_s0, %s303_s0, %s304_s7  }
  0x23   :  { %295 = dma.done.wait [#allocation3], 128  }
  0x24   :  { %296 = vsyncadd [#allocation3], 4294967168 }
  0x25   :  { %297 = dma.done.wait [#allocation6], 1024  }
  0x26   :  { %298 = vsyncadd [#allocation6], 4294966272  ;;  %v305_v0 = vmov 0.0   ;;  %vm306_vm0 = vmmov 0   ;;  %v219_v1 = vld [vmem:[#allocation5] sm:$0xff]   ;;  %v220_v2 = vld [vmem:[#allocation5 + $0x8] sm:$0xff]  }
  0x27   :  { %192 = vmatprep.subr.bf16.mxu0 %v305_v0  ;;  %208 = vmatprep.mubr.msk.bf16.mxu0 %vm306_vm0, %v305_v0  ;;  %v221_v3 = vld [vmem:[#allocation5 + $0x10] sm:$0xff]   ;;  %v222_v4 = vld [vmem:[#allocation5 + $0x18] sm:$0xff]   ;;  %v223_v5 = vld [vmem:[#allocation5 + $0x20] sm:$0xff]   ;;  %s307_s11 = smov [#allocation7]  }
  0x28   :  { %193 = vmatpush3.bf16.msra.mxu0 %v219_v1  ;;  %v224_v6 = vld [vmem:[#allocation5 + $0x28] sm:$0xff]   ;;  %v225_v7 = vld [vmem:[#allocation5 + $0x30] sm:$0xff]   ;;  %v226_v8 = vld [vmem:[#allocation5 + $0x38] sm:$0xff]   ;;  %s164_s12 = sshll.u32 %s307_s11, 4  ;;  %s165_s12 = int_to_ptr.vmem [resolvable:$true] %s164_s12 }
  0x29   :  { %194 = vmatprep.subr.bf16.mxu0 %v305_v0  ;;  %v42_v9 = vld [vmem:[#allocation2] sm:$0xff]  ;;  %s273_s13 = scalar_lea.vmem %s165_s12, 128  ;;  %p278_p3 = scmp.lt.s32.totalorder %s165_s12, %s165_s12 }
  0x2a   :  { %v43_v10 = vpack.c.bf16 %v42_v9, %v42_v9  ;;  %v174_v11 = vld [vmem:[%s376_s2] ss:$0 sm:$0xff]  ;;  %p274_p2 = scmp.ne.s32.totalorder %s165_s12, %s273_s13  ;;  %p279_p4 = scmp.lt.s32.totalorder %s273_s13, %s273_s13 }
  0x2c   :  { %195 = vmatpush3.bf16.msra.mxu0 %v220_v2  ;;  %p280_p5 = por %p279_p4, %p278_p3 }
  0x2d   :  { %196 = vmatprep.subr.bf16.mxu0 %v305_v0 }
  0x2e   :  { %p281_p6 = pnand %p280_p5, %p274_p2 }
  0x30   :  { %197 = vmatpush3.bf16.msra.mxu0 %v221_v3 }
  0x31   :  { %198 = vmatprep.subr.bf16.mxu0 %v305_v0 }
  0x34   :  { %199 = vmatpush3.bf16.msra.mxu0 %v222_v4 }
  0x35   :  { %200 = vmatprep.subr.bf16.mxu0 %v305_v0 }
  0x38   :  { %201 = vmatpush3.bf16.msra.mxu0 %v223_v5 }
  0x39   :  { %202 = vmatprep.subr.bf16.mxu0 %v305_v0 }
  0x3c   :  { %203 = vmatpush3.bf16.msra.mxu0 %v224_v6 }
  0x3d   :  { %204 = vmatprep.subr.bf16.mxu0 %v305_v0 }
  0x40   :  { %205 = vmatpush3.bf16.msra.mxu0 %v225_v7 }
  0x41   :  { %206 = vmatprep.subr.bf16.mxu0 %v305_v0 }
  0x44   :  { %207 = vmatpush3.bf16.msra.mxu0 %v226_v8 }
  0x47   :  { %209 = vmatmul.mubr.bf16.vlgmr.msra.gmra.mrb[0].mxu0 %v43_v10 }
 0x11a   :  { %v149_v12 = vpop.f32.mrb[0].mxu0 }
 0x11b   :  { %v150_v13 = vadd.f32 %v174_v11, %v149_v12  ;;  %v210_v14 = vpop.f32.mrb[1].mxu0 }
 0x11c   :  { %v152_v15 = vpop.f32.mrb[2].mxu0 }
 0x11d   :  { %v155_v16 = vadd.f32 %v150_v13, %v42_v9  ;;  %v211_v17 = vpop.f32.mrb[3].mxu0 }
 0x11f   :  { %227 = vtanh.f32 %v155_v16 }
 0x129   :  { %v228_v18 = vpop.eup %227 }
 0x12a   :  { %157 = vst [vmem:[#allocation7] sm:$0xff] %v228_v18 }
 0x12b   :  { %284 = shalt.err (!%p281_p6)
}
 0x12c   :  { %s285_s15 = scalar_lea.hbm %s377_s3, 128 }
 0x12d   :  { %p286_p7 = scmp.ne.s32.totalorder %s377_s3, %s285_s15  ;;  %p289_p8 = scmp.lt.u32.totalorder %s285_s15, %s377_s3 }
 0x12f   :  { %p291_p9 = pnand %p289_p8, %p286_p7 }
 0x131   :  { %294 = shalt.err (!%p291_p9)
}
 0x132   :  { %167 = dma.vmem_to_hbm [thread:$0]  %s165_s12, 128, %s377_s3, [#allocation4]  }
 0x133   :  { %299 = dma.done.wait [#allocation4], 128  }
 0x134   :  { %300 = vsyncadd [#allocation4], 4294967168 }
 0x135   :  { %171 = vsyncpa [#allocation3], 1 }
 0x136   :  { %172 = vsyncpa [#allocation6], 1 }
 0x137   :  { %173 = vsyncpa [#allocation4], 1 }

</bundles_post_ra>
